<compile_context>
chip_gen: v7x
topology: tpu7x:2x2x1
jax: 0.10.0
libtpu: 0.0.40
codegen_flags: <defaults>
</compile_context>

<pallas_src>
from functools import partial

import jax
import jax.numpy as jnp
from jax.experimental import pallas as pl
from jax.experimental.pallas import tpu as pltpu


_VMEM_BUDGET = 12 * 1024 * 1024   # stay under v5e's 16 MiB scoped-VMEM default


def _dense_kernel(w_ref, x_ref, o_ref):
    """Single contraction tile: o = W @ x straight to the output block."""
    # w_ref: (TCo, Cin), x_ref: (Cin, TL), o_ref: (TCo, TL)
    o_ref[...] = jnp.dot(w_ref[...], x_ref[...],
                         preferred_element_type=jnp.float32).astype(o_ref.dtype)


def _dense_kernel_acc(w_ref, x_ref, o_ref, acc_ref):
    """K-tiled contraction: accumulate in f32 VMEM scratch, finalize last k."""
    k = pl.program_id(3)

    @pl.when(k == 0)
    def _():
        acc_ref[...] = jnp.zeros_like(acc_ref)

    acc_ref[...] += jnp.dot(w_ref[...], x_ref[...],
                            preferred_element_type=jnp.float32)

    @pl.when(k == pl.num_programs(3) - 1)
    def _():
        o_ref[...] = acc_ref[...].astype(o_ref.dtype)


def _shrink_mult(t, mult):
    """Roughly halve t while keeping it a multiple of `mult` (and >= mult)."""
    if t > mult:
        return max(mult, (t // 2) // mult * mult)
    return t


def _dense_nclt(x, w, out_dtype, *, max_resident_k=1024):
    """out[n, o, l] = sum_c w[o, c] * x[n, c, l] for x of shape (N, Cin, L)."""
    N, Cin, L = x.shape
    Cout = w.shape[0]

    xb = x.dtype.itemsize
    wb = w.dtype.itemsize
    ob = jnp.dtype(out_dtype).itemsize

    # Contraction (Cin) tile: keep the full Cin resident in the common case;
    # only tile when Cin is large *and* cleanly 128-divisible.
    if Cin > max_resident_k:
        TK = next((t for t in (512, 256, 128)
                   if t <= max_resident_k and Cin % t == 0), Cin)
    else:
        TK = Cin
    n_k = Cin // TK

    # Output-channel tile (sublane axis): full Cout unless very large.
    TCo = Cout if Cout <= 1024 else 512
    # Lane tile over the flattened non-channel axis (T or H*W*T).
    # NOTE: for NCT inputs with very small T the lane axis is narrow; packing
    # several batch samples per block (in-kernel XLU transpose) would improve
    # lane utilization, but such blocks are tiny anyway.
    TL = L if L <= 1024 else 1024

    # Keep the double-buffered footprint under the VMEM budget.
    def footprint(tk, tco, tl):
        f = 2 * tk * tl * xb + 2 * tco * tk * wb + 2 * tco * tl * ob
        if n_k > 1:
            f += tco * tl * 4              # f32 accumulator scratch
        return f

    while footprint(TK, TCo, TL) > _VMEM_BUDGET:
        if TL > 128:
            TL = _shrink_mult(TL, 128)
        elif TCo > 128:
            TCo = _shrink_mult(TCo, 8)
        else:
            break

    n_l = pl.cdiv(L, TL)
    n_co = pl.cdiv(Cout, TCo)
    out_shape = jax.ShapeDtypeStruct((N, Cout, L), out_dtype)

    if n_k == 1:
        # Common case: no reduction loop, no accumulator, direct MXU -> store.
        # co is innermost so the x block is reused (DMA elided) across co.
        grid = (N, n_l, n_co)
        return pl.pallas_call(
            _dense_kernel,
            out_shape=out_shape,
            grid=grid,
            in_specs=[
                # weight: constant index map -> VMEM resident when n_co == 1
                pl.BlockSpec((TCo, TK), lambda n, l, co: (co, 0)),
                pl.BlockSpec((None, TK, TL), lambda n, l, co: (n, 0, l)),
            ],
            out_specs=pl.BlockSpec((None, TCo, TL),
                                   lambda n, l, co: (n, co, l)),
            compiler_params=pltpu.CompilerParams(
                dimension_semantics=("parallel", "parallel", "parallel")),
        )(w, x)

    # Large-Cin fallback: K-tiled reduction with an f32 accumulator.
    grid = (N, n_l, n_co, n_k)              # reduction axis last
    return pl.pallas_call(
        _dense_kernel_acc,
        out_shape=out_shape,
        grid=grid,
        in_specs=[
            pl.BlockSpec((TCo, TK), lambda n, l, co, k: (co, k)),
            pl.BlockSpec((None, TK, TL), lambda n, l, co, k: (n, k, l)),
        ],
        out_specs=pl.BlockSpec((None, TCo, TL),
                               lambda n, l, co, k: (n, co, l)),
        scratch_shapes=[pltpu.VMEM((TCo, TL), jnp.float32)],
        compiler_params=pltpu.CompilerParams(
            dimension_semantics=("parallel", "parallel", "parallel",
                                 "arbitrary")),
    )(w, x)


@partial(jax.jit, static_argnames=("compute_dtype",))
def dense_synapse_forward(x, weight, compute_dtype=None):
    """Forward of lava.lib.dl.slayer.synapse.Dense (int in_neurons case:
    Conv3d with a (1,1,1) kernel, bias=False, groups=1, pre_hook_fx=None).

    x             : (N, Cin, T) or (N, Cin, H, W, T)
    weight        : (Cout, Cin, 1, 1, 1)   -- torch Conv3d weight layout
    compute_dtype : optional MXU operand dtype (e.g. jnp.bfloat16).
                    Accumulation is f32 and the output keeps x's dtype.
    """
    # TODO(synk): tuple in_neurons variant (full-spatial Conv3d kernel) and the
    # host-side weight transforms (weight_norm / pre_hook_fx) are not covered;
    # apply them to `weight` before calling this function.
    Cout, Cin = weight.shape[0], weight.shape[1]
    w2d = weight.reshape(Cout, Cin)

    out_dtype = x.dtype
    if compute_dtype is not None:
        x = x.astype(compute_dtype)
        w2d = w2d.astype(compute_dtype)

    if x.ndim == 3:
        return _dense_nclt(x, w2d, out_dtype)                  # (N, Cout, T)
    elif x.ndim == 5:
        N, C, H, W, T = x.shape
        x3 = x.reshape(N, Cin, H * W * T)                      # free reshape
        out = _dense_nclt(x3, w2d, out_dtype)
        return out.reshape(N, Cout, H, W, T)                   # free reshape
    raise ValueError(f"expected NCT or NCHWT input, got shape {x.shape}")


if __name__ == "__main__":
    key = jax.random.PRNGKey(0)
    k1, k2, k3, k4 = jax.random.split(key, 4)

    # ---- Case 1: NCT input (canonical Dense usage) -------------------------
    N, Cin, Cout, T = 2, 64, 128, 8
    x_nct = jax.random.normal(k1, (N, Cin, T), jnp.float32)
    # torch Conv3d default init: kaiming-uniform bound = 1/sqrt(fan_in).
    bound = 1.0 / float(Cin) ** 0.5
    weight = jax.random.uniform(k2, (Cout, Cin, 1, 1, 1), jnp.float32,
                                -bound, bound)

    out = jax.block_until_ready(dense_synapse_forward(x_nct, weight))
    ref = jnp.einsum("nct,oc->not", x_nct, weight.reshape(Cout, Cin))
    assert out.shape == ref.shape, (out.shape, ref.shape)
    assert jnp.allclose(out, ref, atol=1e-3, rtol=1e-3), (
        float(jnp.max(jnp.abs(out - ref))))

    # ---- Case 2: NCHWT input (Dense over channels of a spatial spike map) --
    N2, Cin2, Cout2, H, W, T2 = 2, 4, 32, 16, 16, 8
    x_5d = jax.random.normal(k3, (N2, Cin2, H, W, T2), jnp.float32)
    bound2 = 1.0 / float(Cin2) ** 0.5
    weight2 = jax.random.uniform(k4, (Cout2, Cin2, 1, 1, 1), jnp.float32,
                                 -bound2, bound2)

    out2 = jax.block_until_ready(dense_synapse_forward(x_5d, weight2))
    ref2 = jnp.einsum("nchwt,oc->nohwt", x_5d, weight2.reshape(Cout2, Cin2))
    assert out2.shape == ref2.shape, (out2.shape, ref2.shape)
    assert jnp.allclose(out2, ref2, atol=1e-3, rtol=1e-3), (
        float(jnp.max(jnp.abs(out2 - ref2))))

    # ---- Case 3: bf16 operands (f32 accumulation, f32 output) --------------
    out3 = jax.block_until_ready(
        dense_synapse_forward(x_nct, weight, compute_dtype=jnp.bfloat16))
    x_bf = x_nct.astype(jnp.bfloat16).astype(jnp.float32)
    w_bf = weight.reshape(Cout, Cin).astype(jnp.bfloat16).astype(jnp.float32)
    ref3 = jnp.einsum("nct,oc->not", x_bf, w_bf)
    assert out3.dtype == jnp.float32
    assert jnp.allclose(out3, ref3, atol=5e-3, rtol=5e-3), (
        float(jnp.max(jnp.abs(out3 - ref3))))

    # ---- Case 4: force the K-tiled accumulator variant ---------------------
    k5, k6 = jax.random.split(k4)
    N4, Cin4, Cout4, T4 = 2, 256, 64, 128
    x4 = jax.random.normal(k5, (N4, Cin4, T4), jnp.float32)
    w4 = jax.random.uniform(k6, (Cout4, Cin4), jnp.float32, -0.1, 0.1)
    out4 = jax.block_until_ready(
        _dense_nclt(x4, w4, jnp.float32, max_resident_k=128))
    ref4 = jnp.einsum("nct,oc->not", x4, w4)
    assert jnp.allclose(out4, ref4, atol=1e-3, rtol=1e-3), (
        float(jnp.max(jnp.abs(out4 - ref4))))

    print("KERNEL_OK")
</pallas_src>

<mosaic_0001>
module attributes {stable_mosaic.version = 11 : i64} {
  func.func @_dense_kernel(%arg0: i32, %arg1: i32, %arg2: i32, %arg3: memref<128x64xf32, #tpu.memory_space<vmem>>, %arg4: memref<1x64x8xf32, #tpu.memory_space<vmem>>, %arg5: memref<1x128x8xf32, #tpu.memory_space<vmem>>) attributes {dimension_semantics = [#tpu.dimension_semantics<parallel>, #tpu.dimension_semantics<parallel>, #tpu.dimension_semantics<parallel>], iteration_bounds = array<i64: 2, 1, 1>, scalar_prefetch = 0 : i64, scratch_operands = 0 : i64, tpu.core_type = #tpu.core_type<tc>, window_params = [{transform_indices = @transform_0, window_bounds = array<i64: 128, 64>}, {transform_indices = @transform_1, window_bounds = array<i64: 1, 64, 8>}, {transform_indices = @transform_2, window_bounds = array<i64: 1, 128, 8>}]} {
    %c0 = arith.constant 0 : index
    %c0_0 = arith.constant 0 : index
    %0 = vector.load %arg3[%c0, %c0_0] : memref<128x64xf32, #tpu.memory_space<vmem>>, vector<128x64xf32>
    %c0_1 = arith.constant 0 : index
    %c0_2 = arith.constant 0 : index
    %c0_3 = arith.constant 0 : index
    %1 = vector.load %arg4[%c0_1, %c0_2, %c0_3] : memref<1x64x8xf32, #tpu.memory_space<vmem>>, vector<1x64x8xf32>
    %2 = vector.shape_cast %1 : vector<1x64x8xf32> to vector<64x8xf32>
    %cst = arith.constant dense<0.000000e+00> : vector<128x8xf32>
    %3 = tpu.matmul %0, %2, %cst {dimension_numbers = #tpu.dot_dimension_numbers<[1], [0], [0], [1], [0, 0, 1, 1], [], []>} : vector<128x64xf32>, vector<64x8xf32>, vector<128x8xf32> -> vector<128x8xf32>
    %c0_4 = arith.constant 0 : index
    %c0_5 = arith.constant 0 : index
    %c0_6 = arith.constant 0 : index
    %4 = vector.load %arg5[%c0_4, %c0_5, %c0_6] : memref<1x128x8xf32, #tpu.memory_space<vmem>>, vector<1x128x8xf32>
    %5 = vector.shape_cast %4 : vector<1x128x8xf32> to vector<128x8xf32>
    %6 = vector.shape_cast %3 : vector<128x8xf32> to vector<1x128x8xf32>
    tpu.vector_store %arg5[%c0_4, %c0_5, %c0_6], %6 {strides = array<i32>} : memref<1x128x8xf32, #tpu.memory_space<vmem>>, vector<1x128x8xf32>,
    return
  }
  func.func @transform_0(%arg0: i32, %arg1: i32, %arg2: i32) -> (i32, i32) {
    %c0_i32 = arith.constant 0 : i32
    %c0_i32_0 = arith.constant 0 : i32
    return %arg2, %c0_i32 : i32, i32
  }
  func.func @transform_1(%arg0: i32, %arg1: i32, %arg2: i32) -> (i32, i32, i32) {
    %c0_i32 = arith.constant 0 : i32
    %c0_i32_0 = arith.constant 0 : i32
    return %arg0, %c0_i32, %arg1 : i32, i32, i32
  }
  func.func @transform_2(%arg0: i32, %arg1: i32, %arg2: i32) -> (i32, i32, i32) {
    %c0_i32 = arith.constant 0 : i32
    return %arg0, %arg2, %arg1 : i32, i32, i32
  }
}

</mosaic_0001>

<bundles_post_ra>
// kernel: dense_synapse_forward.1
= control target key start
LH: loop header
LB: loop body
LE: loop exit
PB: predicated region body
PF: predicated region fallthrough
CT: control target
= control target key end

     0   :  { %s746_s9 = smov 0   ;;  %s748_s10 = smov 0   ;;  %s881_s0 = inlined_call_operand.vmem [shape: f32[128,64], index: 0, kind: input, shape index: {}]   ;;  %s882_s1 = inlined_call_operand.vmem [shape: f32[2,64,8], index: 1, kind: input, shape index: {}]   ;;  %s883_s2 = inlined_call_operand.vmem [shape: f32[2,128,8], index: 2, kind: output, shape index: {}]  }
   0x1   :  { %s750_s11 = smov 0  }
   0x2 LB: > { %s31_s12 = sadd.s32 1, %s725_s10  ;;  %p570_p0 = scmp.ge.s32.totalorder %s729_s11, 1  ;;  %s729_s11 = sphi %s750_s11, %s12_s11   ;;  %s725_s10 = sphi %s748_s10, %s885_s10   ;;  %s721_s9 = sphi %s746_s9, %s884_s9  }
   0x3   : > { %p33_p1 = scmp.ge.s32.totalorder %s31_s12, 2  ;;  %p151_p2 = scmp.lt.s32.totalorder %s729_s11, 3 }
   0x5   : > { %s887_s12 = smov (%p33_p1, %s31_s12), 0  ;;  %p152_p3 = pnand %p570_p0, %p151_p2 }
   0x6   : > { %p194_p4 = scmp.lt.s32.totalorder (!%p152_p3), %s721_s9, 1  ;;  %v215_v0 = vld [vmem:[%s881_s0] sm:$0xff] (!%p152_p3)  ;;  %vm239_vm0 = vcmask (!%p152_p3), 523264   ;;  %v216_v14 = vld [vmem:[%s881_s0 + $0x8] sm:$0xff] (!%p152_p3)  ;;  %v217_v16 = vld [vmem:[%s881_s0 + $0x10] sm:$0xff] (!%p152_p3)  ;;  %vm433_vm1 = vcmask (!%p152_p3), 64512  }
   0x7   : > { %155 = sbr.rel (%p152_p3) target bundleno = 262 (0x106), region = 28  ;;  %v223_v1 = vld [vmem:[%s881_s0 + $0x40] sm:$0xff] (!%p152_p3)  ;;  %635 = vmatprep.mubr.msk.f32.mxu0 (!%p152_p3), %vm239_vm0, %v215_v0  ;;  %v224_v15 = vld [vmem:[%s881_s0 + $0x48] sm:$0xff] (!%p152_p3)  ;;  %v225_v17 = vld [vmem:[%s881_s0 + $0x50] sm:$0xff] (!%p152_p3) }
   0x8   : > { %647 = vmatprep.mubr.msk.f32.mxu1 (!%p152_p3), %vm239_vm0, %v223_v1  ;;  %v218_v18 = vld [vmem:[%s881_s0 + $0x18] sm:$0xff] (!%p152_p3)  ;;  %v219_v20 = vld [vmem:[%s881_s0 + $0x20] sm:$0xff] (!%p152_p3)  ;;  %v220_v22 = vld [vmem:[%s881_s0 + $0x28] sm:$0xff] (!%p152_p3) }
   0x9   : > { %v226_v19 = vld [vmem:[%s881_s0 + $0x58] sm:$0xff] (!%p152_p3)  ;;  %v227_v21 = vld [vmem:[%s881_s0 + $0x60] sm:$0xff] (!%p152_p3)  ;;  %v228_v23 = vld [vmem:[%s881_s0 + $0x68] sm:$0xff] (!%p152_p3) }
   0xa   : > { %v221_v24 = vld [vmem:[%s881_s0 + $0x30] sm:$0xff] (!%p152_p3)  ;;  %v222_v26 = vld [vmem:[%s881_s0 + $0x38] sm:$0xff] (!%p152_p3) }
   0xb   : > { %v229_v25 = vld [vmem:[%s881_s0 + $0x70] sm:$0xff] (!%p152_p3)  ;;  %v230_v27 = vld [vmem:[%s881_s0 + $0x78] sm:$0xff] (!%p152_p3) }
   0xe   : > { %s889_s9 = smov (!%p194_p4, %s721_s9), 1 }
   0xf   : > { %s593_s17 = sshll.u32 %s889_s9, 6  ;;  %s594_s25 = sshll.u32 %s889_s9, 7 }
  0x10   : > { %s201_s20 = scalar_lea.vmem %s882_s1, %s593_s17  ;;  %s838_s28 = scalar_lea.vmem %s883_s2, %s594_s25 }
  0x11   : > { %v231_v2 = vld [vmem:[%s201_s20] sm:$0xff]  ;;  %v232_v3 = vld [vmem:[%s201_s20 + $0x8] sm:$0xff]  ;;  %v233_v4 = vld [vmem:[%s201_s20 + $0x10] sm:$0xff] }
  0x12   : > { %v659_v5 = vpack.c.bf16 %v232_v3, %v231_v2  ;;  %v234_v6 = vld [vmem:[%s201_s20 + $0x18] sm:$0xff]  ;;  %v235_v8 = vld [vmem:[%s201_s20 + $0x20] sm:$0xff]  ;;  %v236_v9 = vld [vmem:[%s201_s20 + $0x28] sm:$0xff] }
  0x13   : > { %v663_v7 = vpack.c.bf16 %v234_v6, %v233_v4  ;;  %v667_v10 = vpack.c.bf16 %v236_v9, %v235_v8  ;;  %v237_v11 = vld [vmem:[%s201_s20 + $0x30] sm:$0xff]  ;;  %v238_v12 = vld [vmem:[%s201_s20 + $0x38] sm:$0xff] }
  0x14   : > { %660 = vmatprep.subr.bf16.mxu0 %v659_v5  ;;  %675 = vmatprep.subr.bf16.mxu1 %v659_v5  ;;  %v671_v13 = vpack.c.bf16 %v238_v12, %v237_v11 }
  0x15   : > { %662 = vmatpush3.bf16.msra.mxu0 %v659_v5  ;;  %679 = vmatpush3.bf16.msra.mxu1 %v659_v5 }
  0x16   : > { %664 = vmatprep.subr.bf16.mxu0 %v663_v7  ;;  %676 = vmatprep.subr.bf16.mxu1 %v663_v7 }
  0x19   : > { %666 = vmatpush3.bf16.msra.mxu0 %v663_v7  ;;  %680 = vmatpush3.bf16.msra.mxu1 %v663_v7 }
  0x1a   : > { %668 = vmatprep.subr.bf16.mxu0 %v667_v10  ;;  %677 = vmatprep.subr.bf16.mxu1 %v667_v10 }
  0x1d   : > { %670 = vmatpush3.bf16.msra.mxu0 %v667_v10  ;;  %681 = vmatpush3.bf16.msra.mxu1 %v667_v10 }
  0x1e   : > { %672 = vmatprep.subr.bf16.mxu0 %v671_v13  ;;  %678 = vmatprep.subr.bf16.mxu1 %v671_v13 }
  0x21   : > { %674 = vmatpush3.bf16.msra.mxu0 %v671_v13  ;;  %682 = vmatpush3.bf16.msra.mxu1 %v671_v13 }
  0x24   : > { %636 = vmatmul.mubr.msk.f32.vlgmr.msra.gmra.mrb[0].mxu0 %vm239_vm0, %v216_v14  ;;  %648 = vmatmul.mubr.msk.f32.vlgmr.msra.gmra.mrb[0].mxu1 %vm239_vm0, %v224_v15 }
  0x25   : > { %638 = vmatprep.mubr.msk.f32.mxu0 %vm239_vm0, %v217_v16  ;;  %650 = vmatprep.mubr.msk.f32.mxu1 %vm239_vm0, %v225_v17 }
  0x28   : > { %639 = vmatmul.mubr.msk.f32.gmra.mrb[2].mxu0 %vm239_vm0, %v218_v18  ;;  %651 = vmatmul.mubr.msk.f32.gmra.mrb[2].mxu1 %vm239_vm0, %v226_v19 }
  0x29   : > { %641 = vmatprep.mubr.msk.f32.mxu0 %vm239_vm0, %v219_v20  ;;  %653 = vmatprep.mubr.msk.f32.mxu1 %vm239_vm0, %v227_v21 }
  0x2c   : > { %642 = vmatmul.mubr.msk.f32.gmra.mrb[4].mxu0 %vm239_vm0, %v220_v22  ;;  %654 = vmatmul.mubr.msk.f32.gmra.mrb[4].mxu1 %vm239_vm0, %v228_v23 }
  0x2d   : > { %644 = vmatprep.mubr.msk.f32.mxu0 %vm239_vm0, %v221_v24  ;;  %656 = vmatprep.mubr.msk.f32.mxu1 %vm239_vm0, %v229_v25 }
  0x30   : > { %645 = vmatmul.mubr.msk.f32.gmra.mrb[6].mxu0 %vm239_vm0, %v222_v26  ;;  %657 = vmatmul.mubr.msk.f32.gmra.mrb[6].mxu1 %vm239_vm0, %v230_v27 }
  0xf7   : > { %v637_v28 = vpop.f32.mrb[0].mxu0  ;;  %v649_v29 = vpop.f32.mrb[0].mxu1 }
  0xf8   : > { %435 = vst.msk [vmem:[%s838_s28 + $0x8] sm:$0xff] %vm433_vm1, %v637_v28  ;;  %443 = vst.msk [vmem:[%s838_s28 + $0x48] sm:$0xff] %vm433_vm1, %v649_v29  ;;  %v354_v30 = vpop.f32.mrb[1].mxu0  ;;  %v394_v31 = vpop.f32.mrb[1].mxu1 }
  0xf9   : > { %434 = vst.msk [vmem:[%s838_s28] sm:$0xff] %vm433_vm1, %v354_v30  ;;  %442 = vst.msk [vmem:[%s838_s28 + $0x40] sm:$0xff] %vm433_vm1, %v394_v31 }
  0xfb   : > { %v640_v32 = vpop.f32.mrb[2].mxu0  ;;  %v652_v33 = vpop.f32.mrb[2].mxu1 }
  0xfc   : > { %437 = vst.msk [vmem:[%s838_s28 + $0x18] sm:$0xff] %vm433_vm1, %v640_v32  ;;  %445 = vst.msk [vmem:[%s838_s28 + $0x58] sm:$0xff] %vm433_vm1, %v652_v33  ;;  %v364_v34 = vpop.f32.mrb[3].mxu0  ;;  %v404_v35 = vpop.f32.mrb[3].mxu1 }
  0xfd   : > { %436 = vst.msk [vmem:[%s838_s28 + $0x10] sm:$0xff] %vm433_vm1, %v364_v34  ;;  %444 = vst.msk [vmem:[%s838_s28 + $0x50] sm:$0xff] %vm433_vm1, %v404_v35 }
  0xff   : > { %v643_v36 = vpop.f32.mrb[4].mxu0  ;;  %v655_v37 = vpop.f32.mrb[4].mxu1 }
 0x100   : > { %439 = vst.msk [vmem:[%s838_s28 + $0x28] sm:$0xff] %vm433_vm1, %v643_v36  ;;  %447 = vst.msk [vmem:[%s838_s28 + $0x68] sm:$0xff] %vm433_vm1, %v655_v37  ;;  %v374_v38 = vpop.f32.mrb[5].mxu0  ;;  %v414_v39 = vpop.f32.mrb[5].mxu1 }
 0x101   : > { %438 = vst.msk [vmem:[%s838_s28 + $0x20] sm:$0xff] %vm433_vm1, %v374_v38  ;;  %446 = vst.msk [vmem:[%s838_s28 + $0x60] sm:$0xff] %vm433_vm1, %v414_v39 }
 0x103   : > { %v646_v40 = vpop.f32.mrb[6].mxu0  ;;  %v658_v41 = vpop.f32.mrb[6].mxu1 }
 0x104   : > { %441 = vst.msk [vmem:[%s838_s28 + $0x38] sm:$0xff] %vm433_vm1, %v646_v40  ;;  %449 = vst.msk [vmem:[%s838_s28 + $0x78] sm:$0xff] %vm433_vm1, %v658_v41  ;;  %v384_v42 = vpop.f32.mrb[7].mxu0  ;;  %v424_v43 = vpop.f32.mrb[7].mxu1 }
 0x105   : > { %440 = vst.msk [vmem:[%s838_s28 + $0x30] sm:$0xff] %vm433_vm1, %v384_v42  ;;  %448 = vst.msk [vmem:[%s838_s28 + $0x70] sm:$0xff] %vm433_vm1, %v424_v43 }
 0x106 PF: > { %s12_s11 = sadd.s32 1, %s729_s11   ;;  %s884_s9 = smov %s725_s10 }
 0x107   : > { %p9_p5 = scmp.ge.s32.totalorder %s12_s11, 4   ;;  %s885_s10 = smov %s887_s12 }
 0x109   :  { %11 = sbr.rel (!%p9_p5) target bundleno = 2 (0x2), region = 61 }

</bundles_post_ra>
